<compile_context>
chip_gen: v5e
topology: v5e:2x2
jax: 0.10.0
libtpu: 0.0.40
codegen_flags: <defaults>
</compile_context>

<pallas_src>
import jax
import jax.numpy as jnp
from jax.experimental import pallas as pl
from jax.experimental.pallas import tpu as pltpu


def _jumprelu_kernel(thresh_ref, x_ref, o_ref):
    # thresh_ref: SMEM (1,) scalar.  x_ref / o_ref: VMEM (block_rows, lane_width) tiles.
    x = x_ref[...]
    t = thresh_ref[0]
    o_ref[...] = jnp.where(x > t, x, jnp.zeros_like(x))


_LANE_CANDIDATES = (4096, 2048, 1024, 512, 256, 128)
_TARGET_TILE_BYTES = 2 << 20   # ~2 MiB per tile: near HBM roofline, VMEM-safe everywhere
_PALLAS_MIN_ELEMS = 1 << 16    # below ~64K elements, fixed launch cost dwarfs the work


def _sublane_multiple(dtype):
    bits = jnp.dtype(dtype).itemsize * 8
    if bits >= 32:
        return 8
    if bits == 16:
        return 16
    return 32


def jumprelu(x, threshold, *, training=False, min_pallas_elems=_PALLAS_MIN_ELEMS):
    """JumpReLU forward matching the PyTorch module (any shape, scalar threshold)."""
    if training:
        # TODO(synk): straight-through gradient estimator is a custom_vjp (backward) concern;
        # the training-mode forward value is exactly x, so no kernel work is needed here.
        return x

    total = x.size
    thresh_scalar = jnp.asarray(threshold, dtype=x.dtype)

    # Tiny or awkwardly-sized tensors: plain fused elementwise is strictly faster.
    if total < min_pallas_elems or total % 128 != 0:
        return jnp.where(x > thresh_scalar, x, jnp.zeros((), x.dtype))

    # Flatten row-major into a lane-dense 2-D slab (widest last dim dividing the size).
    lane_width = next(l for l in _LANE_CANDIDATES if total % l == 0)
    rows = total // lane_width
    x2 = x.reshape(rows, lane_width)

    itemsize = jnp.dtype(x.dtype).itemsize
    sub = _sublane_multiple(x.dtype)
    row_bytes = lane_width * itemsize

    if rows * row_bytes <= _TARGET_TILE_BYTES or rows < sub:
        block_rows = rows  # whole row extent in one block (full-dim block is always legal)
    else:
        # Largest sublane-aligned block under the tile budget, then re-balance so the
        # grid's blocks are as even as possible (avoids a tiny, poorly-pipelined tail).
        max_rows = max(sub, (_TARGET_TILE_BYTES // row_bytes) // sub * sub)
        num_blocks = pl.cdiv(rows, max_rows)
        balanced = pl.cdiv(pl.cdiv(rows, num_blocks), sub) * sub
        block_rows = min(max_rows, balanced)

    grid = (pl.cdiv(rows, block_rows),)   # no host-side pad; any tail block is edge-masked
    thresh_arr = thresh_scalar.reshape((1,))

    out = pl.pallas_call(
        _jumprelu_kernel,
        out_shape=jax.ShapeDtypeStruct((rows, lane_width), x.dtype),
        grid=grid,
        in_specs=[
            pl.BlockSpec(memory_space=pltpu.MemorySpace.SMEM),          # threshold scalar
            pl.BlockSpec((block_rows, lane_width), lambda i: (i, 0)),   # x tile
        ],
        out_specs=pl.BlockSpec((block_rows, lane_width), lambda i: (i, 0)),
        compiler_params=pltpu.CompilerParams(
            dimension_semantics=("parallel",),   # load-bearing on v7x (2 TCs/chip)
        ),
    )(thresh_arr, x2)

    return out.reshape(x.shape)


if __name__ == "__main__":
    key = jax.random.PRNGKey(0)
    threshold = 0.01  # module __init__ default (nn.Parameter(torch.tensor(0.01)))

    def ref(x, t):
        return x * (x > t).astype(x.dtype)

    # 1) Small NCHW input consistent with the module's use; force the Pallas path
    #    (default wrapper would take the tiny-input XLA fallback here).
    x_small = jax.random.normal(key, (2, 4, 16, 16), dtype=jnp.float32) * 0.05
    y_small = jax.block_until_ready(jumprelu(x_small, threshold, min_pallas_elems=0))
    assert y_small.shape == x_small.shape and y_small.dtype == x_small.dtype
    assert jnp.array_equal(y_small, ref(x_small, threshold))

    # The default (fallback) path for tiny inputs must agree bit-for-bit.
    y_small_fb = jax.block_until_ready(jumprelu(x_small, threshold))
    assert jnp.array_equal(y_small_fb, y_small)

    # 2) Larger input exercising the tuned Pallas path: rows=144, lane_width=4096,
    #    block_rows=72 -> grid=(2,) with perfectly balanced, fully-unmasked blocks.
    k1, _ = jax.random.split(key)
    x_big = jax.random.normal(k1, (4, 36, 64, 64), dtype=jnp.float32) * 0.05
    y_big = jax.block_until_ready(jumprelu(x_big, threshold))
    assert jnp.array_equal(y_big, ref(x_big, threshold))

    # 3) bf16 path (16-sublane multiple) through the Pallas kernel.
    x_bf16 = (jax.random.normal(k1, (2, 8, 64, 64), dtype=jnp.float32) * 0.05).astype(jnp.bfloat16)
    y_bf16 = jax.block_until_ready(jumprelu(x_bf16, threshold, min_pallas_elems=0))
    assert jnp.array_equal(y_bf16, ref(x_bf16, jnp.bfloat16(threshold)))

    # 4) Training-mode forward value equals x exactly.
    y_train = jax.block_until_ready(jumprelu(x_small, threshold, training=True))
    assert jnp.array_equal(y_train, x_small)

    print("KERNEL_OK")
</pallas_src>

<mosaic_0001>
module attributes {stable_mosaic.version = 11 : i64} {
  func.func @_jumprelu_kernel(%arg0: i32, %arg1: memref<1xf32, #tpu.memory_space<smem>>, %arg2: memref<1x2048xf32, #tpu.memory_space<vmem>>, %arg3: memref<1x2048xf32, #tpu.memory_space<vmem>>) attributes {dimension_semantics = [#tpu.dimension_semantics<parallel>], iteration_bounds = array<i64: 1>, scalar_prefetch = 0 : i64, scratch_operands = 0 : i64, tpu.core_type = #tpu.core_type<tc>, window_params = [{transform_indices = @transform_0, window_bounds = array<i64: 1>}, {transform_indices = @transform_1, window_bounds = array<i64: 1, 2048>}, {transform_indices = @transform_2, window_bounds = array<i64: 1, 2048>}]} {
    %c0 = arith.constant 0 : index
    %c0_0 = arith.constant 0 : index
    %0 = vector.load %arg2[%c0, %c0_0] : memref<1x2048xf32, #tpu.memory_space<vmem>>, vector<1x2048xf32>
    %c0_1 = arith.constant 0 : index
    %1 = memref.load %arg1[%c0_1] : memref<1xf32, #tpu.memory_space<smem>>
    %2 = vector.broadcast %1 : f32 to vector<1x2048xf32>
    %3 = arith.cmpf ogt, %0, %2 : vector<1x2048xf32>
    %cst = arith.constant 0.000000e+00 : f32
    %4 = vector.broadcast %cst : f32 to vector<1x2048xf32>
    %5 = arith.select %3, %0, %4 : vector<1x2048xi1>, vector<1x2048xf32>
    %c0_2 = arith.constant 0 : index
    %c0_3 = arith.constant 0 : index
    %6 = vector.load %arg3[%c0_2, %c0_3] : memref<1x2048xf32, #tpu.memory_space<vmem>>, vector<1x2048xf32>
    tpu.vector_store %arg3[%c0_2, %c0_3], %5 {strides = array<i32>} : memref<1x2048xf32, #tpu.memory_space<vmem>>, vector<1x2048xf32>,
    return
  }
  func.func @transform_0(%arg0: i32) -> i32 {
    %c0_i32 = arith.constant 0 : i32
    %c0_i32_0 = arith.constant 0 : i32
    return %c0_i32 : i32
  }
  func.func @transform_1(%arg0: i32) -> (i32, i32) {
    %c0_i32 = arith.constant 0 : i32
    %c0_i32_0 = arith.constant 0 : i32
    return %arg0, %c0_i32 : i32, i32
  }
  func.func @transform_2(%arg0: i32) -> (i32, i32) {
    %c0_i32 = arith.constant 0 : i32
    %c0_i32_0 = arith.constant 0 : i32
    return %arg0, %c0_i32 : i32, i32
  }
}

</mosaic_0001>

<bundles_post_ra>
// kernel: tpu_custom_call.1
= control target key start
LH: loop header
LB: loop body
LE: loop exit
PB: predicated region body
PF: predicated region fallthrough
CT: control target
= control target key end

     0   :  { %8 = vsyncpa [#allocation4], 0  ;;  %s134_s0 = inlined_call_operand.<no memory space> [shape: f32[1], index: 0, kind: input, shape index: {}]   ;;  %s135_s1 = inlined_call_operand.hbm [shape: f32[1,2048], index: 1, kind: input, shape index: {}]   ;;  %s136_s2 = inlined_call_operand.hbm [shape: f32[1,2048], index: 2, kind: output, shape index: {}]  }
   0x1   :  { %9 = vsyncpa [#allocation5], 0  ;;  %s17_s11 = sshll.u32 %s135_s1, 4  ;;  %s108_s12 = smov [#allocation3]   ;;  %s18_s11 = int_to_ptr.hbm [resolvable:$true] %s17_s11 }
   0x2   :  { %s19_s13 = sshll.u32 %s108_s12, 4  ;;  %s20_s13 = int_to_ptr.vmem [resolvable:$true] %s19_s13 }
   0x3   :  { %22 = dma.hbm_to_vmem [thread:$0]  %s18_s11, 256, %s20_s13, [#allocation4]  }
   0x4   :  { %104 = dma.done.wait [#allocation4], 256  }
   0x5   :  { %105 = vsyncadd [#allocation4], 4294967040  ;;  %v30_v0 = vstv %s134_s0  ;;  %s109_s16 = smov [#allocation6]   ;;  %s44_s20 = sshll.u32 %s136_s2, 4  ;;  %v27_v1 = vld [vmem:[#allocation3] sm:$0xff]  ;;  %v28_v2 = vld [vmem:[#allocation3 + $0x8] sm:$0xff]  ;;  %s45_s20 = int_to_ptr.hbm [resolvable:$true] %s44_s20 }
   0x6   :  { %s42_s17 = sshll.u32 %s109_s16, 4  ;;  %vm31_vm0 = vcmp.gt.f32.partialorder %v27_v1, %v30_v0  ;;  %vm32_vm1 = vcmp.gt.f32.partialorder %v28_v2, %v30_v0  ;;  %s43_s17 = int_to_ptr.vmem [resolvable:$true] %s42_s17 }
   0x7   :  { %v33_v3 = vsel %vm31_vm0, %v27_v1, 0.0  ;;  %v34_v4 = vsel %vm32_vm1, %v28_v2, 0.0 }
   0x8   :  { %35 = vst [vmem:[#allocation6] sm:$0xff] %v33_v3 }
   0x9   :  { %36 = vst [vmem:[#allocation6 + $0x8] sm:$0xff] %v34_v4 }
   0xa   :  { %47 = dma.vmem_to_hbm [thread:$0]  %s43_s17, 256, %s45_s20, [#allocation5]  }
   0xb   :  { %106 = dma.done.wait [#allocation5], 256  }
   0xc   :  { %107 = vsyncadd [#allocation5], 4294967040 }
   0xd   :  { %52 = vsyncpa [#allocation4], 1 }
   0xe   :  { %53 = vsyncpa [#allocation5], 1 }

</bundles_post_ra>
